<compile_context>
chip_gen: v7x
topology: tpu7x:2x2x1
jax: 0.10.0
libtpu: 0.0.40
codegen_flags: <defaults>
</compile_context>

<pallas_src>
import jax
import jax.numpy as jnp
from jax import lax
from jax.experimental import pallas as pl
from jax.experimental.pallas import tpu as pltpu


def _round_up(x, m):
    return (x + m - 1) // m * m


def _linear_kernel(x_ref, w_ref, b_ref, o_ref):
    # x_ref: [bm, in_n]      (bf16)
    # w_ref: [out_pad, in_n] (bf16, PyTorch layout - no wrapper transpose)
    # b_ref: [1, out_pad]    (f32)
    # o_ref: [bm, out_pad]   (f32, lane-dense: out_pad % 128 == 0)
    acc = lax.dot_general(
        x_ref[...], w_ref[...],
        dimension_numbers=(((1,), (1,)), ((), ())),   # contract in_n with in_n
        preferred_element_type=jnp.float32,
    )
    o_ref[...] = (acc + b_ref[...]).astype(o_ref.dtype)


def prepare_classifier_params(weight, bias, *, compute_dtype=jnp.bfloat16):
    """One-time parameter prep (do this at init time, NOT per forward call).

    Keeps the PyTorch [out_n, in_n] layout (no transpose) and zero-pads out_n
    up to a multiple of 128 so the kernel output is lane-dense.
    """
    out_n, in_n = weight.shape
    out_pad = _round_up(out_n, 128)
    w_p = jnp.zeros((out_pad, in_n), compute_dtype).at[:out_n, :].set(
        weight.astype(compute_dtype))
    b_p = jnp.zeros((1, out_pad), jnp.float32).at[0, :out_n].set(
        bias.astype(jnp.float32))
    return w_p, b_p, out_n


def latent_classifier_forward(x, w_padded, b_padded, out_n, *,
                              block_b=256, compute_dtype=jnp.bfloat16):
    """y = x @ W.T + b  (nn.Linear forward), bf16 matmul with f32 accumulation."""
    B, in_n = x.shape
    out_pad = w_padded.shape[0]
    x_c = x.astype(compute_dtype)

    if B <= block_b:
        # Small batch: single whole-array VMEM block, no grid, no pipelining.
        y_pad = pl.pallas_call(
            _linear_kernel,
            out_shape=jax.ShapeDtypeStruct((B, out_pad), x.dtype),
            in_specs=[
                pl.BlockSpec(memory_space=pltpu.MemorySpace.VMEM),
                pl.BlockSpec(memory_space=pltpu.MemorySpace.VMEM),
                pl.BlockSpec(memory_space=pltpu.MemorySpace.VMEM),
            ],
            out_specs=pl.BlockSpec(memory_space=pltpu.MemorySpace.VMEM),
        )(x_c, w_padded, b_padded)
        return y_pad[:, :out_n]

    # Larger batches: tile over B, mark it "parallel" so v7x's second
    # TensorCore takes half the rows (no change on v5e/v6e).
    B_pad = _round_up(B, block_b)
    if B_pad != B:
        x_c = jnp.zeros((B_pad, in_n), compute_dtype).at[:B].set(x_c)
    y_pad = pl.pallas_call(
        _linear_kernel,
        out_shape=jax.ShapeDtypeStruct((B_pad, out_pad), x.dtype),
        grid=(B_pad // block_b,),
        in_specs=[
            pl.BlockSpec((block_b, in_n), lambda i: (i, 0)),
            pl.BlockSpec((out_pad, in_n), lambda i: (0, 0)),
            pl.BlockSpec((1, out_pad), lambda i: (0, 0)),
        ],
        out_specs=pl.BlockSpec((block_b, out_pad), lambda i: (i, 0)),
        compiler_params=pltpu.CompilerParams(
            dimension_semantics=("parallel",)),
    )(x_c, w_padded, b_padded)
    return y_pad[:B, :out_n]


if __name__ == "__main__":
    # Small shapes consistent with the module: in_n=64 latent features -> out_n=32 classes.
    B, in_n, out_n = 8, 64, 32

    key = jax.random.PRNGKey(0)
    kx, kw, kb = jax.random.split(key, 3)

    x = jax.random.normal(kx, (B, in_n), dtype=jnp.float32)
    # Deterministic synthetic parameters (nn.Linear-style shapes).
    weight = jax.random.normal(kw, (out_n, in_n), dtype=jnp.float32) * 0.05
    bias = jax.random.normal(kb, (out_n,), dtype=jnp.float32) * 0.05

    # One-time param prep (layout + lane-dense padding + bf16 cast).
    w_p, b_p, _ = prepare_classifier_params(weight, bias)

    # Small-batch (gridless) path.
    y = latent_classifier_forward(x, w_p, b_p, out_n)
    jax.block_until_ready(y)
    y_ref = x @ weight.T + bias
    assert y.shape == (B, out_n)
    assert jnp.allclose(y, y_ref, atol=2e-2, rtol=2e-2), float(
        jnp.max(jnp.abs(y - y_ref)))

    # Batched path (grid over B, "parallel" for v7x's two TensorCores).
    B2 = 512
    x2 = jax.random.normal(jax.random.PRNGKey(1), (B2, in_n), dtype=jnp.float32)
    y2 = latent_classifier_forward(x2, w_p, b_p, out_n, block_b=256)
    jax.block_until_ready(y2)
    y2_ref = x2 @ weight.T + bias
    assert y2.shape == (B2, out_n)
    assert jnp.allclose(y2, y2_ref, atol=2e-2, rtol=2e-2), float(
        jnp.max(jnp.abs(y2 - y2_ref)))

    print("KERNEL_OK")
</pallas_src>

<mosaic_0001>
module attributes {stable_mosaic.version = 11 : i64} {
  func.func @_linear_kernel(%arg0: memref<8x64xbf16, #tpu.memory_space<vmem>>, %arg1: memref<128x64xbf16, #tpu.memory_space<vmem>>, %arg2: memref<1x128xf32, #tpu.memory_space<vmem>>, %arg3: memref<8x128xf32, #tpu.memory_space<vmem>>) attributes {dimension_semantics = [], scalar_prefetch = 0 : i64, scratch_operands = 0 : i64, tpu.core_type = #tpu.core_type<tc>} {
    %c0 = arith.constant 0 : index
    %c0_0 = arith.constant 0 : index
    %0 = vector.load %arg0[%c0, %c0_0] : memref<8x64xbf16, #tpu.memory_space<vmem>>, vector<8x64xbf16>
    %c0_1 = arith.constant 0 : index
    %c0_2 = arith.constant 0 : index
    %1 = vector.load %arg1[%c0_1, %c0_2] : memref<128x64xbf16, #tpu.memory_space<vmem>>, vector<128x64xbf16>
    %cst = arith.constant dense<0.000000e+00> : vector<8x128xf32>
    %2 = tpu.matmul %0, %1, %cst {dimension_numbers = #tpu.dot_dimension_numbers<[1], [1], [0], [0], [0, 0, 1, 0], [], []>} : vector<8x64xbf16>, vector<128x64xbf16>, vector<8x128xf32> -> vector<8x128xf32>
    %c0_3 = arith.constant 0 : index
    %c0_4 = arith.constant 0 : index
    %3 = vector.load %arg2[%c0_3, %c0_4] : memref<1x128xf32, #tpu.memory_space<vmem>>, vector<1x128xf32>
    %4 = vector.broadcast %3 : vector<1x128xf32> to vector<8x128xf32>
    %5 = arith.addf %2, %4 : vector<8x128xf32>
    %c0_5 = arith.constant 0 : index
    %c0_6 = arith.constant 0 : index
    %6 = vector.load %arg3[%c0_5, %c0_6] : memref<8x128xf32, #tpu.memory_space<vmem>>, vector<8x128xf32>
    tpu.vector_store %arg3[%c0_5, %c0_6], %5 {strides = array<i32>} : memref<8x128xf32, #tpu.memory_space<vmem>>, vector<8x128xf32>,
    return
  }
}

</mosaic_0001>

<bundles_post_ra>
// kernel: tpu_custom_call.1
= control target key start
LH: loop header
LB: loop body
LE: loop exit
PB: predicated region body
PF: predicated region fallthrough
CT: control target
= control target key end

     0   :  { %v237_v1 = vmov 0.0   ;;  %vm80_vm0 = vcmask 523264   ;;  %vm238_vm1 = vmmov 0   ;;  %s311_s0 = inlined_call_operand.vmem [shape: bf16[8,64], index: 0, kind: input, shape index: {}]   ;;  %s312_s1 = inlined_call_operand.vmem [shape: bf16[128,64], index: 1, kind: input, shape index: {}]   ;;  %s313_s2 = inlined_call_operand.vmem [shape: f32[1,128], index: 2, kind: input, shape index: {}]   ;;  %s314_s3 = inlined_call_operand.hbm [shape: f32[8,128], index: 3, kind: output, shape index: {}]  }
   0x1   :  { %v205_v0 = vld [vmem:[%s312_s1] sm:$0xff]   ;;  %182 = vmatprep.subr.bf16.mxu0 %v237_v1  ;;  %v206_v3 = vld [vmem:[%s312_s1 + $0x8] sm:$0xff]   ;;  %198 = vmatprep.mubr.msk.bf16.mxu0 %vm238_vm1, %v237_v1 }
   0x2   :  { %v85_v2 = vsel %vm80_vm0, %v205_v0, 0  ;;  %v88_v4 = vsel %vm80_vm0, %v206_v3, 0 }
   0x3   :  { %183 = vmatpush3.bf16.xpose.msra.mxu0 %v85_v2 }
   0x4   :  { %184 = vmatprep.subr.bf16.mxu0 %v237_v1 }
   0x5   :  { %8 = vsyncpa [#allocation3], 0  ;;  %v207_v5 = vld [vmem:[%s312_s1 + $0x10] sm:$0xff]   ;;  %v208_v7 = vld [vmem:[%s312_s1 + $0x18] sm:$0xff]   ;;  %s239_s5 = smov [#allocation2]  }
   0x6   :  { %v91_v6 = vsel %vm80_vm0, %v207_v5, 0  ;;  %v94_v8 = vsel %vm80_vm0, %v208_v7, 0  ;;  %v209_v9 = vld [vmem:[%s312_s1 + $0x20] sm:$0xff]   ;;  %v210_v11 = vld [vmem:[%s312_s1 + $0x28] sm:$0xff]   ;;  %v211_v13 = vld [vmem:[%s312_s1 + $0x30] sm:$0xff]   ;;  %s155_s6 = sshll.u32 %s239_s5, 4  ;;  %s156_s6 = int_to_ptr.vmem [resolvable:$true] %s155_s6 }
   0x7   :  { %v97_v10 = vsel %vm80_vm0, %v209_v9, 0  ;;  %v100_v12 = vsel %vm80_vm0, %v210_v11, 0  ;;  %v103_v14 = vsel %vm80_vm0, %v211_v13, 0  ;;  %v212_v15 = vld [vmem:[%s312_s1 + $0x38] sm:$0xff]   ;;  %v16_v17 = vld [vmem:[%s311_s0] sm:$0xf]  ;;  %p218_p1 = scmp.lt.s32.totalorder %s156_s6, %s156_s6 }
   0x8   :  { %v106_v16 = vsel %vm80_vm0, %v212_v15, 0  ;;  %v163_v18 = vld [vmem:[%s313_s2] ss:$0 sm:$0xff]  ;;  %s213_s1 = scalar_lea.vmem %s156_s6, 128 }
   0x9   :  { %p214_p0 = scmp.ne.s32.totalorder %s156_s6, %s213_s1  ;;  %p219_p2 = scmp.lt.s32.totalorder %s213_s1, %s213_s1 }
   0xb   :  { %185 = vmatpush3.bf16.xpose.msra.mxu0 %v88_v4  ;;  %p220_p3 = por %p219_p2, %p218_p1 }
   0xc   :  { %186 = vmatprep.subr.bf16.mxu0 %v237_v1 }
   0xd   :  { %p221_p4 = pnand %p220_p3, %p214_p0 }
  0x13   :  { %187 = vmatpush3.bf16.xpose.msra.mxu0 %v91_v6 }
  0x14   :  { %188 = vmatprep.subr.bf16.mxu0 %v237_v1 }
  0x1b   :  { %189 = vmatpush3.bf16.xpose.msra.mxu0 %v94_v8 }
  0x1c   :  { %190 = vmatprep.subr.bf16.mxu0 %v237_v1 }
  0x23   :  { %191 = vmatpush3.bf16.xpose.msra.mxu0 %v97_v10 }
  0x24   :  { %192 = vmatprep.subr.bf16.mxu0 %v237_v1 }
  0x2b   :  { %193 = vmatpush3.bf16.xpose.msra.mxu0 %v100_v12 }
  0x2c   :  { %194 = vmatprep.subr.bf16.mxu0 %v237_v1 }
  0x33   :  { %195 = vmatpush3.bf16.xpose.msra.mxu0 %v103_v14 }
  0x34   :  { %196 = vmatprep.subr.bf16.mxu0 %v237_v1 }
  0x3b   :  { %197 = vmatpush3.bf16.xpose.msra.mxu0 %v106_v16 }
  0x42   :  { %199 = vmatmul.mubr.msk.bf16.vlgmr.msra.gmra.mrb[0].mxu0 %vm80_vm0, %v16_v17 }
 0x115   :  { %v142_v19 = vpop.f32.mrb[0].mxu0 }
 0x116   :  { %v143_v20 = vadd.f32 %v163_v18, %v142_v19  ;;  %v200_v21 = vpop.f32.mrb[1].mxu0 }
 0x117   :  { %v145_v22 = vpop.f32.mrb[2].mxu0 }
 0x118   :  { %148 = vst [vmem:[#allocation2] sm:$0xff] %v143_v20  ;;  %v201_v23 = vpop.f32.mrb[3].mxu0 }
 0x119   :  { %224 = shalt.err (!%p221_p4)
}
 0x11a   :  { %s225_s2 = scalar_lea.hbm %s314_s3, 128 }
 0x11b   :  { %p226_p5 = scmp.ne.s32.totalorder %s314_s3, %s225_s2  ;;  %p229_p6 = scmp.lt.u32.totalorder %s225_s2, %s314_s3 }
 0x11d   :  { %p231_p7 = pnand %p229_p6, %p226_p5 }
 0x11f   :  { %234 = shalt.err (!%p231_p7)
}
 0x120   :  { %158 = dma.vmem_to_hbm [thread:$0]  %s156_s6, 128, %s314_s3, [#allocation3]  }
 0x121   :  { %235 = dma.done.wait [#allocation3], 128  }
 0x122   :  { %236 = vsyncadd [#allocation3], 4294967168 }
 0x123   :  { %162 = vsyncpa [#allocation3], 1 }

</bundles_post_ra>
